<compile_context>
chip_gen: v7x
topology: tpu7x:2x2x1
jax: 0.10.0
libtpu: 0.0.40
codegen_flags: <defaults>
</compile_context>

<pallas_src>
import jax
import jax.numpy as jnp
from jax.experimental import pallas as pl
from jax.experimental.pallas import tpu as pltpu

# ---- problem sizes (small, consistent with the module's forward) ----
B = 8           # batch
D = 31          # input_dim  (combined dim = D + 1 = 32)
T = 16          # number of decision-stump "trees" in the RF surrogate
OUT = 10        # nn.Linear(input_dim + 1, 10)
OUT_PAD = 128   # lane-dense output width; sliced back to OUT in the wrapper


def hybrid_kernel(x_ref, rhs_ref, p_ref, o_ref):
    """Fused forward pass for one batch tile.

    x_ref   : (tb, D)            input features
    rhs_ref : (D, OUT_PAD + T)   [ W[:D,:] zero-padded to 128 lanes | feat_onehot ]
    p_ref   : (8, OUT_PAD)       row 0: thr      (lanes [:T])
                                 row 1: left / T (lanes [:T])
                                 row 2: right / T(lanes [:T])
                                 row 3: W[D, :]  (lanes [:OUT], rest 0)
                                 row 4: bias     (lanes [:OUT], rest 0)
    o_ref   : (tb, OUT_PAD)      padded output logits (cols >= OUT are 0)
    """
    x = x_ref[...]                                                    # (tb, D)

    # One MXU matmul covers both the linear head and the stump feature select.
    r = jnp.dot(x, rhs_ref[...], preferred_element_type=jnp.float32)  # (tb, 128+T)
    xw = r[:, :OUT_PAD]        # (tb, 128)  == X @ W[:D]  (lane-aligned split)
    sel = r[:, OUT_PAD:]       # (tb, T)    == per-tree selected feature value

    p = p_ref[...]                                                    # (8, 128)
    thr = p[0:1, :T]
    left = p[1:2, :T]          # already divided by T (mean folded in)
    right = p[2:3, :T]
    w_last = p[3:4, :]         # (1, 128)
    bias = p[4:5, :]           # (1, 128)

    # rf_model.predict(X): stump ensemble; mean == sum of pre-scaled leaves.
    leaf = jnp.where(sel <= thr, left, right)                         # (tb, T)
    rf_pred = jnp.sum(leaf, axis=-1, keepdims=True)                   # (tb, 1)

    # cat([X, rf_pred], 1) @ W.T + b  ==  X@W[:D] + rf_pred*W[D] + b
    o_ref[...] = (xw + rf_pred * w_last + bias).astype(o_ref.dtype)


def _round_up(x, m):
    return ((x + m - 1) // m) * m


def hybrid_forward(x, rhs, params, *, tile_b=256):
    """Run the fused kernel over a batch grid; returns (B, OUT) logits."""
    bx, dx = x.shape
    tb = min(tile_b, _round_up(bx, 8))        # sublane-aligned batch tile
    pb = _round_up(bx, tb)
    if pb != bx:
        x = jnp.pad(x, ((0, pb - bx), (0, 0)))
    grid = (pb // tb,)

    out = pl.pallas_call(
        hybrid_kernel,
        out_shape=jax.ShapeDtypeStruct((pb, OUT_PAD), jnp.float32),
        grid=grid,
        in_specs=[
            pl.BlockSpec((tb, dx), lambda i: (i, 0)),            # x: tiled on batch
            pl.BlockSpec(rhs.shape, lambda i: (0, 0)),           # fused RHS: whole
            pl.BlockSpec(params.shape, lambda i: (0, 0)),        # packed params: whole
        ],
        out_specs=pl.BlockSpec((tb, OUT_PAD), lambda i: (i, 0)),
        compiler_params=pltpu.CompilerParams(
            dimension_semantics=("parallel",)),
    )(x, rhs, params)

    return out[:bx, :OUT]


def init_params(key):
    """Raw parameters (PyTorch-style layout) for the RF surrogate + Linear."""
    k_feat, k_thr, k_l, k_r, k_w, k_b = jax.random.split(key, 6)
    feat_idx = jax.random.randint(k_feat, (T,), 0, D)
    feat_onehot = jax.nn.one_hot(feat_idx, D, dtype=jnp.float32).T       # (D, T)
    thr = jax.random.normal(k_thr, (T,), jnp.float32) * 0.5
    left = jax.random.normal(k_l, (T,), jnp.float32)
    right = jax.random.normal(k_r, (T,), jnp.float32)
    # nn.Linear(D+1, OUT): weight (OUT, D+1), bias (OUT,)
    bound = 1.0 / jnp.sqrt(jnp.float32(D + 1))
    weight = jax.random.uniform(k_w, (OUT, D + 1), jnp.float32, -bound, bound)
    bias = jax.random.uniform(k_b, (OUT,), jnp.float32, -bound, bound)
    return dict(feat_onehot=feat_onehot, thr=thr, left=left, right=right,
                weight=weight, bias=bias)


def pack_params(raw):
    """Wrapper-side layout plumbing: fused MXU RHS + one (8,128) params slab."""
    w_t = raw["weight"].T                                                # (D+1, OUT)
    w_main = jnp.zeros((D, OUT_PAD), jnp.float32).at[:, :OUT].set(w_t[:D, :])
    rhs = jnp.concatenate([w_main, raw["feat_onehot"]], axis=1)          # (D, 128+T)

    params = jnp.zeros((8, OUT_PAD), jnp.float32)
    params = params.at[0, :T].set(raw["thr"])
    params = params.at[1, :T].set(raw["left"] / T)                       # fold mean
    params = params.at[2, :T].set(raw["right"] / T)
    params = params.at[3, :OUT].set(w_t[D, :])                           # last W row
    params = params.at[4, :OUT].set(raw["bias"])
    return rhs, params


def reference_forward(x, raw):
    """Plain-JAX reference mirroring the PyTorch forward exactly."""
    sel = x @ raw["feat_onehot"]                                         # (B, T)
    leaf = jnp.where(sel <= raw["thr"][None, :],
                     raw["left"][None, :], raw["right"][None, :])
    rf_pred = jnp.mean(leaf, axis=-1, keepdims=True)                     # unsqueeze(1)
    combined = jnp.concatenate([x, rf_pred], axis=1)                     # cat(dim=1)
    return combined @ raw["weight"].T + raw["bias"][None, :]             # fc


if __name__ == "__main__":
    key = jax.random.PRNGKey(0)
    k_x, k_p = jax.random.split(key)
    x = jax.random.normal(k_x, (B, D), jnp.float32)

    raw = init_params(k_p)
    rhs, params = pack_params(raw)

    out = hybrid_forward(x, rhs, params)
    out = jax.block_until_ready(out)

    ref = reference_forward(x, raw)
    assert out.shape == (B, OUT)
    assert jnp.allclose(out, ref, atol=1e-5, rtol=1e-5), "mismatch vs reference"

    print("KERNEL_OK")
</pallas_src>

<mosaic_0001>
module attributes {stable_mosaic.version = 11 : i64} {
  func.func @hybrid_kernel(%arg0: i32, %arg1: memref<8x31xf32, #tpu.memory_space<vmem>>, %arg2: memref<31x144xf32, #tpu.memory_space<vmem>>, %arg3: memref<8x128xf32, #tpu.memory_space<vmem>>, %arg4: memref<8x128xf32, #tpu.memory_space<vmem>>) attributes {dimension_semantics = [#tpu.dimension_semantics<parallel>], iteration_bounds = array<i64: 1>, scalar_prefetch = 0 : i64, scratch_operands = 0 : i64, tpu.core_type = #tpu.core_type<tc>, window_params = [{transform_indices = @transform_0, window_bounds = array<i64: 8, 31>}, {pipeline_mode = #tpu.pipeline_mode<synchronous>, transform_indices = @transform_1, window_bounds = array<i64: 31, 144>}, {pipeline_mode = #tpu.pipeline_mode<synchronous>, transform_indices = @transform_2, window_bounds = array<i64: 8, 128>}, {transform_indices = @transform_3, window_bounds = array<i64: 8, 128>}]} {
    %c0 = arith.constant 0 : index
    %c0_0 = arith.constant 0 : index
    %0 = vector.load %arg1[%c0, %c0_0] : memref<8x31xf32, #tpu.memory_space<vmem>>, vector<8x31xf32>
    %c0_1 = arith.constant 0 : index
    %c0_2 = arith.constant 0 : index
    %1 = vector.load %arg2[%c0_1, %c0_2] : memref<31x144xf32, #tpu.memory_space<vmem>>, vector<31x144xf32>
    %cst = arith.constant dense<0.000000e+00> : vector<8x144xf32>
    %2 = tpu.matmul %0, %1, %cst {dimension_numbers = #tpu.dot_dimension_numbers<[1], [0], [0], [1], [0, 0, 1, 1], [], []>} : vector<8x31xf32>, vector<31x144xf32>, vector<8x144xf32> -> vector<8x144xf32>
    %3 = vector.extract_strided_slice %2 {offsets = [0, 0], sizes = [8, 128], strides = [1, 1]} : vector<8x144xf32> to vector<8x128xf32>
    %4 = vector.extract_strided_slice %2 {offsets = [0, 128], sizes = [8, 16], strides = [1, 1]} : vector<8x144xf32> to vector<8x16xf32>
    %c0_3 = arith.constant 0 : index
    %c0_4 = arith.constant 0 : index
    %5 = vector.load %arg3[%c0_3, %c0_4] : memref<8x128xf32, #tpu.memory_space<vmem>>, vector<8x128xf32>
    %6 = vector.extract_strided_slice %5 {offsets = [0, 0], sizes = [1, 16], strides = [1, 1]} : vector<8x128xf32> to vector<1x16xf32>
    %7 = vector.extract_strided_slice %5 {offsets = [1, 0], sizes = [1, 16], strides = [1, 1]} : vector<8x128xf32> to vector<1x16xf32>
    %8 = vector.extract_strided_slice %5 {offsets = [2, 0], sizes = [1, 16], strides = [1, 1]} : vector<8x128xf32> to vector<1x16xf32>
    %9 = vector.extract_strided_slice %5 {offsets = [3, 0], sizes = [1, 128], strides = [1, 1]} : vector<8x128xf32> to vector<1x128xf32>
    %10 = vector.extract_strided_slice %5 {offsets = [4, 0], sizes = [1, 128], strides = [1, 1]} : vector<8x128xf32> to vector<1x128xf32>
    %11 = vector.broadcast %6 : vector<1x16xf32> to vector<8x16xf32>
    %12 = arith.cmpf ole, %4, %11 : vector<8x16xf32>
    %13 = vector.shape_cast %7 : vector<1x16xf32> to vector<1x16xf32>
    %14 = vector.broadcast %13 : vector<1x16xf32> to vector<8x16xf32>
    %15 = vector.shape_cast %8 : vector<1x16xf32> to vector<1x16xf32>
    %16 = vector.broadcast %15 : vector<1x16xf32> to vector<8x16xf32>
    %17 = arith.select %12, %14, %16 : vector<8x16xi1>, vector<8x16xf32>
    %cst_5 = arith.constant dense<0.000000e+00> : vector<8xf32>
    %18 = vector.multi_reduction <add>, %17, %cst_5 [1] : vector<8x16xf32> to vector<8xf32>
    %19 = vector.shape_cast %18 : vector<8xf32> to vector<8x1xf32>
    %20 = vector.broadcast %19 : vector<8x1xf32> to vector<8x128xf32>
    %21 = vector.broadcast %9 : vector<1x128xf32> to vector<8x128xf32>
    %22 = arith.mulf %20, %21 : vector<8x128xf32>
    %23 = arith.addf %3, %22 : vector<8x128xf32>
    %24 = vector.broadcast %10 : vector<1x128xf32> to vector<8x128xf32>
    %25 = arith.addf %23, %24 : vector<8x128xf32>
    %c0_6 = arith.constant 0 : index
    %c0_7 = arith.constant 0 : index
    %26 = vector.load %arg4[%c0_6, %c0_7] : memref<8x128xf32, #tpu.memory_space<vmem>>, vector<8x128xf32>
    tpu.vector_store %arg4[%c0_6, %c0_7], %25 {strides = array<i32>} : memref<8x128xf32, #tpu.memory_space<vmem>>, vector<8x128xf32>,
    return
  }
  func.func @transform_0(%arg0: i32) -> (i32, i32) {
    %c0_i32 = arith.constant 0 : i32
    %c0_i32_0 = arith.constant 0 : i32
    return %arg0, %c0_i32 : i32, i32
  }
  func.func @transform_1(%arg0: i32) -> (i32, i32) {
    %c0_i32 = arith.constant 0 : i32
    %c0_i32_0 = arith.constant 0 : i32
    %c0_i32_1 = arith.constant 0 : i32
    return %c0_i32, %c0_i32_0 : i32, i32
  }
  func.func @transform_2(%arg0: i32) -> (i32, i32) {
    %c0_i32 = arith.constant 0 : i32
    %c0_i32_0 = arith.constant 0 : i32
    %c0_i32_1 = arith.constant 0 : i32
    return %c0_i32, %c0_i32_0 : i32, i32
  }
  func.func @transform_3(%arg0: i32) -> (i32, i32) {
    %c0_i32 = arith.constant 0 : i32
    %c0_i32_0 = arith.constant 0 : i32
    return %arg0, %c0_i32 : i32, i32
  }
}

</mosaic_0001>

<bundles_post_ra>
// kernel: tpu_custom_call.1
= control target key start
LH: loop header
LB: loop body
LE: loop exit
PB: predicated region body
PF: predicated region fallthrough
CT: control target
= control target key end

     0   :  { %8 = vsyncpa [#allocation3], 0  ;;  %s381_s0 = inlined_call_operand.hbm [shape: f32[8,31], index: 0, kind: input, shape index: {}]   ;;  %s382_s1 = inlined_call_operand.hbm [shape: f32[31,144], index: 1, kind: input, shape index: {}]   ;;  %s383_s2 = inlined_call_operand.hbm [shape: f32[8,128], index: 2, kind: input, shape index: {}]   ;;  %s384_s3 = inlined_call_operand.hbm [shape: f32[8,128], index: 3, kind: output, shape index: {}]  }
   0x1   :  { %9 = vsyncpa [#allocation6], 0 }
   0x2   :  { %10 = vsyncpa [#allocation4], 0  ;;  %s305_s12 = smov [#allocation5]   ;;  %s211_s16 = scalar_lea.hbm %s382_s1, 1024 }
   0x3   :  { %s26_s13 = sshll.u32 %s305_s12, 4  ;;  %p212_p0 = scmp.ne.s32.totalorder %s382_s1, %s211_s16  ;;  %s27_s13 = int_to_ptr.vmem [resolvable:$true] %s26_s13 }
   0x4   :  { %p215_p1 = scmp.lt.u32.totalorder %s211_s16, %s382_s1 }
   0x6   :  { %p217_p2 = pnand %p215_p1, %p212_p0 }
   0x8   :  { %220 = shalt.err (!%p217_p2)
}
   0x9   :  { %s221_s21 = scalar_lea.vmem %s27_s13, 1024  ;;  %p226_p4 = scmp.lt.s32.totalorder %s27_s13, %s27_s13 }
   0xa   :  { %p222_p3 = scmp.ne.s32.totalorder %s27_s13, %s221_s21  ;;  %p227_p5 = scmp.lt.s32.totalorder %s221_s21, %s221_s21 }
   0xc   :  { %p228_p6 = por %p227_p5, %p226_p4 }
   0xe   :  { %p229_p7 = pnand %p228_p6, %p222_p3 }
  0x10   :  { %232 = shalt.err (!%p229_p7)
}
  0x11   :  { %s306_s22 = smov 256   ;;  %s307_s23 = smov 16  }
  0x12   :  { %32 = dma.hbm_to_vmem [thread:$0]  %s382_s1, 1024, %s27_s13, [#allocation6], %s306_s22, %s306_s22, %s307_s23  }
  0x13   :  { %s308_s26 = smov [#allocation2]   ;;  %s309_s28 = smov [#allocation7]  }
  0x14   :  { %s17_s27 = sshll.u32 %s308_s26, 4  ;;  %s39_s29 = sshll.u32 %s309_s28, 4  ;;  %s18_s27 = int_to_ptr.vmem [resolvable:$true] %s17_s27  ;;  %s40_s29 = int_to_ptr.vmem [resolvable:$true] %s39_s29 }
  0x15   :  { %s233_s5 = scalar_lea.hbm %s381_s0, 128 }
  0x16   :  { %p234_p8 = scmp.ne.s32.totalorder %s381_s0, %s233_s5  ;;  %p237_p9 = scmp.lt.u32.totalorder %s233_s5, %s381_s0 }
  0x18   :  { %p239_p10 = pnand %p237_p9, %p234_p8 }
  0x1a   :  { %242 = shalt.err (!%p239_p10)
}
  0x1b   :  { %s243_s1 = scalar_lea.vmem %s18_s27, 128  ;;  %p248_p12 = scmp.lt.s32.totalorder %s18_s27, %s18_s27 }
  0x1c   :  { %p244_p11 = scmp.ne.s32.totalorder %s18_s27, %s243_s1  ;;  %p249_p13 = scmp.lt.s32.totalorder %s243_s1, %s243_s1 }
  0x1e   :  { %p250_p0 = por %p249_p13, %p248_p12 }
  0x20   :  { %p251_p1 = pnand %p250_p0, %p244_p11 }
  0x22   :  { %254 = shalt.err (!%p251_p1)
}
  0x23   :  { %20 = dma.hbm_to_vmem [thread:$0]  %s381_s0, 128, %s18_s27, [#allocation3]  }
  0x24   :  { %s255_s14 = scalar_lea.hbm %s383_s2, 128 }
  0x25   :  { %p256_p2 = scmp.ne.s32.totalorder %s383_s2, %s255_s14  ;;  %p259_p3 = scmp.lt.u32.totalorder %s255_s14, %s383_s2 }
  0x27   :  { %p261_p4 = pnand %p259_p3, %p256_p2 }
  0x29   :  { %264 = shalt.err (!%p261_p4)
}
  0x2a   :  { %s265_s19 = scalar_lea.vmem %s40_s29, 128  ;;  %p270_p6 = scmp.lt.s32.totalorder %s40_s29, %s40_s29 }
  0x2b   :  { %p266_p5 = scmp.ne.s32.totalorder %s40_s29, %s265_s19  ;;  %p271_p7 = scmp.lt.s32.totalorder %s265_s19, %s265_s19 }
  0x2d   :  { %p272_p8 = por %p271_p7, %p270_p6 }
  0x2f   :  { %p273_p9 = pnand %p272_p8, %p266_p5 }
  0x31   :  { %276 = shalt.err (!%p273_p9)
}
  0x32   :  { %42 = dma.hbm_to_vmem [thread:$0]  %s383_s2, 128, %s40_s29, [#allocation6]  }
  0x33   :  { %299 = dma.done.wait [#allocation3], 128  }
  0x34   :  { %300 = vsyncadd [#allocation3], 4294967168 }
  0x35   :  { %301 = dma.done.wait [#allocation6], 1152  }
  0x36   :  { %302 = vsyncadd [#allocation6], 4294966144  ;;  %v310_v0 = vmov 0.0   ;;  %vm65_vm0 = vcmask 1046528   ;;  %v54_v1 = vld [vmem:[#allocation5 + $0x8] sm:$0xff]  ;;  %v56_v2 = vld [vmem:[#allocation5 + $0x18] sm:$0xff]  ;;  %v144_v14 = vlaneseq }
  0x37   :  { %136 = vmatprep.mubr.f32.mxu0 %v310_v0  ;;  %v53_v3 = vld [vmem:[#allocation5] sm:$0xff]  ;;  %v193_v4 = vpack.c.bf16 %v56_v2, %v54_v1  ;;  %v55_v5 = vld [vmem:[#allocation5 + $0x10] sm:$0xff]  ;;  %v58_v6 = vld [vmem:[#allocation5 + $0x28] sm:$0xff]  ;;  %vm311_vm1 = vmmov 1   ;;  %vm61_vm3 = vcmask 252928   ;;  %vm158_vm4 = vcmask 130048  }
  0x38   :  { %v60_v7 = vld [vmem:[#allocation5 + $0x38] sm:$0x7f]  ;;  %v195_v8 = vpack.c.bf16 %v55_v5, %v53_v3  ;;  %vm198_vm2 = vmpackc.low %vm65_vm0, %vm311_vm1  ;;  %v57_v10 = vld [vmem:[#allocation5 + $0x20] sm:$0xff]  ;;  %v145_v15 = vshrl.u32 %v144_v14, 7  ;;  %s312_s2 = smov [#allocation8]  }
  0x39   :  { %v197_v9 = vpack.c.bf16 %v60_v7, %v58_v6  ;;  %v59_v11 = vld [vmem:[#allocation5 + $0x30] sm:$0x7f]  ;;  %194 = vmatprep.subr.bf16.mxu0 %v193_v4  ;;  %v52_v13 = vld [vmem:[#allocation2] sm:$0xff]  ;;  %v143_v17 = vld [vmem:[#allocation7] sm:$0xff]  ;;  %s180_s21 = sshll.u32 %s312_s2, 4  ;;  %s181_s21 = int_to_ptr.vmem [resolvable:$true] %s180_s21 }
  0x3a   :  { %196 = vmatpush1.bf16.msra.mxu0 %v195_v8  ;;  %v200_v12 = vpack.c.bf16 %v59_v11, %v57_v10  ;;  %v146_v16 = vsub.s32 0, %v145_v15  ;;  %v151_v18 = vsub.s32 1, %v145_v15  ;;  %v155_v19 = vsub.s32 2, %v145_v15  ;;  %s277_s22 = scalar_lea.vmem %s181_s21, 128  ;;  %p282_p11 = scmp.lt.s32.totalorder %s181_s21, %s181_s21 }
  0x3b   :  { %199 = vmatprep.subr.msk.bf16.mxu0 %vm198_vm2, %v197_v9  ;;  %v164_v27 = vsub.s32 3, %v145_v15  ;;  %v170_v29 = vsub.s32 4, %v145_v15  ;;  %p278_p10 = scmp.ne.s32.totalorder %s181_s21, %s277_s22  ;;  %p283_p12 = scmp.lt.s32.totalorder %s277_s22, %s277_s22 }
  0x3c   :  { %v147_v20 = vrot.slane %v143_v17, %v146_v16  ;;  %v152_v21 = vrot.slane %v143_v17, %v151_v18  ;;  %v156_v22 = vrot.slane %v143_v17, %v155_v19 }
  0x3d   :  { %v165_v28 = vrot.slane %v143_v17, %v164_v27  ;;  %v171_v32 = vrot.slane %v143_v17, %v170_v29  ;;  %p284_p13 = por %p283_p12, %p282_p11 }
  0x3e   :  { %202 = vmatpush1.bf16.msk.msra.mxu0 %vm198_vm2, %v200_v12 }
  0x3f   :  { %p285_p0 = pnand %p284_p13, %p278_p10 }
  0x41   :  { %192 = vmatmul.mubr.msk.f32.vlgmr.msra.gmra.mrb[0].mxu0 %vm61_vm3, %v52_v13 }
 0x114   :  { %v138_v23 = vpop.f32.mrb[0].mxu0 }
 0x115   :  { %v140_v24 = vpop.f32.mrb[1].mxu0 }
 0x116   :  { %vm148_vm5 = vcmp.le.f32.partialorder %v140_v24, %v147_v20 }
 0x117   :  { %v157_v25 = vsel %vm148_vm5, %v152_v21, %v156_v22 }
 0x118   :  { %v159_v26 = vsel %vm158_vm4, %v157_v25, 0.0 }
 0x119   :  { %160 = vadd.xlane.f32.xlu0 %v159_v26 }
 0x1a6   :  { %v161_v30 = vpop.xlane.xlu0 %160 }
 0x1a7   :  { %v166_v31 = vmul.f32 %v165_v28, %v161_v30 }
 0x1a9   :  { %v167_v33 = vadd.f32 %v166_v31, %v138_v23 }
 0x1ab   :  { %v172_v34 = vadd.f32 %v171_v32, %v167_v33 }
 0x1ad   :  { %173 = vst [vmem:[#allocation8] sm:$0xff] %v172_v34 }
 0x1ae   :  { %288 = shalt.err (!%p285_p0)
}
 0x1af   :  { %s289_s25 = scalar_lea.hbm %s384_s3, 128 }
 0x1b0   :  { %p290_p1 = scmp.ne.s32.totalorder %s384_s3, %s289_s25  ;;  %p293_p2 = scmp.lt.u32.totalorder %s289_s25, %s384_s3 }
 0x1b2   :  { %p295_p3 = pnand %p293_p2, %p290_p1 }
 0x1b4   :  { %298 = shalt.err (!%p295_p3)
}
 0x1b5   :  { %183 = dma.vmem_to_hbm [thread:$0]  %s181_s21, 128, %s384_s3, [#allocation4]  }
 0x1b6   :  { %303 = dma.done.wait [#allocation4], 128  }
 0x1b7   :  { %304 = vsyncadd [#allocation4], 4294967168 }
 0x1b8   :  { %187 = vsyncpa [#allocation3], 1 }
 0x1b9   :  { %188 = vsyncpa [#allocation6], 1 }
 0x1ba   :  { %189 = vsyncpa [#allocation4], 1 }

</bundles_post_ra>
